<compile_context>
chip_gen: v7x
topology: tpu7x:2x2x1
jax: 0.10.0
libtpu: 0.0.40
codegen_flags: <defaults>
</compile_context>

<pallas_src>
import functools

import jax
import jax.numpy as jnp
from jax.experimental import pallas as pl
from jax.experimental.pallas import tpu as pltpu


def _round_up(v, m):
    return (v + m - 1) // m * m


def _pick_tiles(n):
    """Row/K padding and tile sizes for the dense A @ X aggregation.

    Returns (n_pad_m, n_pad_k, tm, tk)."""
    if n <= 1024:
        # Single block; lane-dense (multiple of 128) on both adjacency dims so
        # loads/stores are unmasked even for tiny graphs.
        n_pad = _round_up(n, 128)
        return n_pad, n_pad, n_pad, n_pad
    if n <= 16384:
        # Full-K stripe (tk = n_pad, no K loop): K padded only to a 256
        # multiple, rows tiled at 256 -> bounded quadratic padding waste while
        # each grid step still streams >= ~0.3 MiB of int8 adjacency.
        n_pad = _round_up(n, 256)
        return n_pad, n_pad, 256, n_pad
    # Huge graphs: big int8 adjacency tiles (review: tm=1024, tk=2048) to
    # amortise per-step overhead and lengthen contiguous DMA rows; relative
    # padding waste is <= ~12% at this size and shrinks with N.
    tm, tk = 1024, 2048
    return _round_up(n, tm), _round_up(n, tk), tm, tk


# ---------------------------------------------------------------------------
# Pallas kernel: one SAGEConv layer, tiled over (row_tile, k_tile).
# ---------------------------------------------------------------------------
def _sage_layer_kernel(inv_deg_ref, adj_ref, xk_ref, xi_ref, wl_ref, wr_ref,
                       b_ref, o_ref, acc_ref, *, apply_relu):
    # inv_deg_ref: (TM, 1)   f32   1 / max(in-degree, 1)
    # adj_ref    : (TM, TK)  int8  incoming-edge counts A[i, j]
    # xk_ref     : (TK, Hp)  bf16  neighbour features (K-side stream)
    # xi_ref     : (TM, Hp)  bf16  self features (root term)
    # wl_ref     : (Hp, Hp)  bf16  W_l^T, zero padded
    # wr_ref     : (Hp, Hp)  bf16  W_r^T, zero padded
    # b_ref      : (1, Hp)   f32   lin_l bias, zero padded
    # o_ref      : (TM, Hp)        output tile
    # acc_ref    : (TM, Hp)  f32   VMEM accumulator (sum aggregation)
    k = pl.program_id(1)

    @pl.when(k == 0)
    def _():
        acc_ref[...] = jnp.zeros_like(acc_ref)

    # int8 counts -> bf16 on the VPU (hidden under the adjacency DMA), then the
    # partial sum-aggregation (TM, TK) @ (TK, Hp) on the MXU, f32 accumulate.
    a_tile = adj_ref[...].astype(jnp.bfloat16)
    acc_ref[...] += jnp.dot(a_tile, xk_ref[...],
                            preferred_element_type=jnp.float32)

    @pl.when(k == pl.num_programs(1) - 1)
    def _():
        # mean = sum * (1/deg); applied once after the K reduction (commutes
        # with the linear sum).  Two separate K=Hp projections (no concatenate)
        # avoid a per-row-tile VMEM copy and match v5e's 128-wide MXU.
        agg = (acc_ref[...] * inv_deg_ref[...]).astype(jnp.bfloat16)
        out = (jnp.dot(agg, wl_ref[...], preferred_element_type=jnp.float32)
               + jnp.dot(xi_ref[...], wr_ref[...],
                         preferred_element_type=jnp.float32)
               + b_ref[...])
        if apply_relu:
            out = jnp.maximum(out, 0.0)
        o_ref[...] = out.astype(o_ref.dtype)


def _vmem_budget_bytes(tm, tk, hp, out_itemsize):
    # Double-buffered pipeline inputs/outputs + the f32 accumulator scratch.
    dbl = 2 * (tm * 4               # inv_deg (f32)
               + tm * tk * 1        # adjacency (int8)
               + tk * hp * 2        # xk (bf16)
               + tm * hp * 2        # xi (bf16)
               + 2 * hp * hp * 2    # W_l^T, W_r^T (bf16)
               + hp * 4             # bias (f32)
               + tm * hp * out_itemsize)
    return dbl + tm * hp * 4        # accumulator scratch


def sage_conv_pallas(inv_deg, adj, x_p, wl_t, wr_t, b_p, *, apply_relu,
                     out_dtype, tm, tk):
    n_pad_m, n_pad_k = adj.shape
    hp = x_p.shape[1]
    grid = (n_pad_m // tm, n_pad_k // tk)
    kernel = functools.partial(_sage_layer_kernel, apply_relu=apply_relu)

    out_itemsize = jnp.dtype(out_dtype).itemsize
    flops = 2 * n_pad_m * n_pad_k * hp + 2 * 2 * n_pad_m * hp * hp
    bytes_accessed = (n_pad_m * n_pad_k * 1                 # int8 adjacency
                      + grid[0] * n_pad_k * hp * 2          # xk re-streams
                      + n_pad_m * hp * 2                    # xi
                      + n_pad_m * hp * out_itemsize         # output
                      + 2 * hp * hp * 2 + hp * 4 + n_pad_m * 4)

    # Explicit scoped-VMEM limit (review): v5e defaults to only 16 MiB scoped,
    # v6e/v7x to 32 MiB; request what the tiles actually need (with headroom)
    # while staying well under v7x's 64 MiB physical VMEM.
    vmem_limit = min(
        max(int(_vmem_budget_bytes(tm, tk, hp, out_itemsize) * 1.5),
            32 * 1024 * 1024),
        48 * 1024 * 1024)

    return pl.pallas_call(
        kernel,
        out_shape=jax.ShapeDtypeStruct((n_pad_m, hp), out_dtype),
        grid_spec=pltpu.PrefetchScalarGridSpec(
            num_scalar_prefetch=0,
            grid=grid,
            in_specs=[
                pl.BlockSpec((tm, 1), lambda i, k: (i, 0)),      # inv_deg
                # TODO(synk): if xprof shows an exposed DMA bubble at row-tile
                # boundaries, add pipeline_mode=pl.Buffered(3) to this spec.
                pl.BlockSpec((tm, tk), lambda i, k: (i, k)),     # adjacency
                pl.BlockSpec((tk, hp), lambda i, k: (k, 0)),     # x (K side)
                pl.BlockSpec((tm, hp), lambda i, k: (i, 0)),     # x (self)
                pl.BlockSpec((hp, hp), lambda i, k: (0, 0)),     # W_l^T
                pl.BlockSpec((hp, hp), lambda i, k: (0, 0)),     # W_r^T
                pl.BlockSpec((1, hp), lambda i, k: (0, 0)),      # bias
            ],
            out_specs=pl.BlockSpec((tm, hp), lambda i, k: (i, 0)),
            scratch_shapes=[pltpu.VMEM((tm, hp), jnp.float32)],
        ),
        # Row tiles shard across v7x's two TensorCores; K is the reduction.
        # TODO(synk): on v7x confirm with xprof that both TCs are busy; if one
        # is idle, switch the row axis to pltpu.CORE_PARALLEL.
        compiler_params=pltpu.CompilerParams(
            dimension_semantics=("parallel", "arbitrary"),
            vmem_limit_bytes=vmem_limit),
        cost_estimate=pl.CostEstimate(flops=flops, transcendentals=0,
                                      bytes_accessed=bytes_accessed),
    )(inv_deg, adj, x_p, x_p, wl_t, wr_t, b_p)


# ---------------------------------------------------------------------------
# Wrapper: build padded operands once, run the two tiled SAGE layers.
# ---------------------------------------------------------------------------
def _pad_proj(w, h, hp):
    # W^T zero-padded to (Hp, Hp); padded K rows only ever multiply zeros.
    return jnp.zeros((hp, hp), jnp.bfloat16).at[:h, :h].set(
        w.T.astype(jnp.bfloat16))


def _pad_bias(b, h, hp):
    return jnp.zeros((1, hp), jnp.float32).at[0, :h].set(b)


def link_prediction_gnn_forward(x, edge_index, params):
    n, h = x.shape
    hp = _round_up(h, 128)                    # lane-dense feature dim
    n_pad_m, n_pad_k, tm, tk = _pick_tiles(n)
    n_pad_x = max(n_pad_m, n_pad_k)           # x plays both the row & K roles

    src = edge_index[0]
    dst = edge_index[1]

    # In-degree straight from the edge list (O(E), exact in f32).
    deg = jnp.zeros((n_pad_m,), jnp.float32).at[dst].add(1.0)
    inv_deg = (1.0 / jnp.maximum(deg, 1.0)).reshape(n_pad_m, 1)

    # Incoming-edge counts built exactly in int32, stored as int8 in HBM to
    # halve the dominant O(N^2) adjacency stream; cast to bf16 in-kernel.
    # TODO(synk): int8 saturates at 127 parallel edges between one node pair;
    # fall back to bf16 adjacency storage for such multigraphs.
    counts = jnp.zeros((n_pad_m, n_pad_k), jnp.int32).at[dst, src].add(1)
    adj = jnp.clip(counts, 0, 127).astype(jnp.int8)

    x_p = jnp.pad(x.astype(jnp.bfloat16), ((0, n_pad_x - n), (0, hp - h)))

    p1, p2 = params["conv1"], params["conv2"]
    wl1, wr1 = _pad_proj(p1["w_l"], h, hp), _pad_proj(p1["w_r"], h, hp)
    wl2, wr2 = _pad_proj(p2["w_l"], h, hp), _pad_proj(p2["w_r"], h, hp)
    b1, b2 = _pad_bias(p1["b_l"], h, hp), _pad_bias(p2["b_l"], h, hp)

    h1 = sage_conv_pallas(inv_deg, adj, x_p, wl1, wr1, b1, apply_relu=True,
                          out_dtype=jnp.bfloat16, tm=tm, tk=tk)
    if n_pad_x > n_pad_m:                     # large-N asymmetric padding only
        h1 = jnp.pad(h1, ((0, n_pad_x - n_pad_m), (0, 0)))

    out = sage_conv_pallas(inv_deg, adj, h1, wl2, wr2, b2, apply_relu=False,
                           out_dtype=jnp.float32, tm=tm, tk=tk)
    return out[:n, :h]


# ---------------------------------------------------------------------------
# Params + pure-JAX f32 reference (for a sanity check).
# ---------------------------------------------------------------------------
def init_params(key, hidden_channels):
    def layer(k):
        k1, k2, k3 = jax.random.split(k, 3)
        scale = 1.0 / jnp.sqrt(hidden_channels)
        return {
            "w_l": jax.random.uniform(
                k1, (hidden_channels, hidden_channels), jnp.float32, -scale, scale),
            "w_r": jax.random.uniform(
                k2, (hidden_channels, hidden_channels), jnp.float32, -scale, scale),
            "b_l": jax.random.uniform(
                k3, (hidden_channels,), jnp.float32, -scale, scale),
        }

    ka, kb = jax.random.split(key)
    return {"conv1": layer(ka), "conv2": layer(kb)}


def _reference_forward(x, edge_index, params):
    n = x.shape[0]
    src, dst = edge_index[0], edge_index[1]
    adj = jnp.zeros((n, n), jnp.float32).at[dst, src].add(1.0)
    a_norm = adj / jnp.maximum(adj.sum(axis=1, keepdims=True), 1.0)

    def layer(p, h_in):
        agg = a_norm @ h_in
        return agg @ p["w_l"].T + h_in @ p["w_r"].T + p["b_l"]

    h1 = jnp.maximum(layer(params["conv1"], x), 0.0)
    return layer(params["conv2"], h1)


if __name__ == "__main__":
    hidden = 32
    fwd = jax.jit(link_prediction_gnn_forward)

    def check(num_nodes, num_edges, key):
        k_x, k_src, k_dst, k_params = jax.random.split(key, 4)
        x = jax.random.normal(k_x, (num_nodes, hidden), dtype=jnp.float32)
        src = jax.random.randint(k_src, (num_edges,), 0, num_nodes, jnp.int32)
        dst = jax.random.randint(k_dst, (num_edges,), 0, num_nodes, jnp.int32)
        edge_index = jnp.stack([src, dst], axis=0)   # (2, E) like PyG
        params = init_params(k_params, hidden)

        out = fwd(x, edge_index, params)
        jax.block_until_ready(out)
        assert out.shape == (num_nodes, hidden)

        ref = _reference_forward(x, edge_index, params)
        # bf16 activations and a bf16 layer-1 intermediate give ~1e-2 relative
        # error vs the f32 reference; tolerate 2% of the output scale.
        max_err = float(jnp.max(jnp.abs(out - ref)))
        scale = float(jnp.max(jnp.abs(ref)))
        assert max_err <= 2e-2 * (1.0 + scale), (
            f"max abs err {max_err} vs output scale {scale}")

    # Small-graph path (single block) -- the module's nominal regime.
    check(num_nodes=8, num_edges=16, key=jax.random.PRNGKey(0))
    # Mid-size path (full-K stripe, several row tiles) -- exercises tiling,
    # the K-axis accumulator revisit logic and the int8 adjacency stream.
    check(num_nodes=1100, num_edges=6000, key=jax.random.PRNGKey(1))

    print("KERNEL_OK")
</pallas_src>

<mosaic_0001>
module attributes {stable_mosaic.version = 11 : i64} {
  func.func private @main(%arg0: i32) attributes {dimension_semantics = [#tpu.dimension_semantics<core_parallel>], iteration_bounds = array<i64: 2>, tpu.core_type = #tpu.core_type<sc_scalar_subcore>, window_params = []} {
    return
  }
}

module attributes {stable_mosaic.version = 11 : i64} {
  func.func private @main(%arg0: i32) attributes {dimension_semantics = [#tpu.dimension_semantics<core_parallel>], iteration_bounds = array<i64: 2>, tpu.core_type = #tpu.core_type<sc_scalar_subcore>, window_params = []} {
    return
  }
}

module attributes {stable_mosaic.version = 11 : i64} {
  func.func @_sage_layer_kernel(%arg0: i32, %arg1: i32, %arg2: memref<128x1xf32, #tpu.memory_space<vmem>>, %arg3: memref<128x128xi8, #tpu.memory_space<vmem>>, %arg4: memref<128x128xbf16, #tpu.memory_space<vmem>>, %arg5: memref<128x128xbf16, #tpu.memory_space<vmem>>, %arg6: memref<128x128xbf16, #tpu.memory_space<vmem>>, %arg7: memref<128x128xbf16, #tpu.memory_space<vmem>>, %arg8: memref<1x128xf32, #tpu.memory_space<vmem>>, %arg9: memref<128x128xf32, #tpu.memory_space<vmem>>, %arg10: memref<128x128xf32, #tpu.memory_space<vmem>>) attributes {dimension_semantics = [#tpu.dimension_semantics<parallel>, #tpu.dimension_semantics<arbitrary>], iteration_bounds = array<i64: 1, 1>, scalar_prefetch = 0 : i64, scratch_operands = 1 : i64, tpu.core_type = #tpu.core_type<tc>, window_params = [{transform_indices = @transform_0, window_bounds = array<i64: 128, 1>}, {transform_indices = @transform_1, window_bounds = array<i64: 128, 128>}, {transform_indices = @transform_2, window_bounds = array<i64: 128, 128>}, {transform_indices = @transform_3, window_bounds = array<i64: 128, 128>}, {pipeline_mode = #tpu.pipeline_mode<synchronous>, transform_indices = @transform_4, window_bounds = array<i64: 128, 128>}, {pipeline_mode = #tpu.pipeline_mode<synchronous>, transform_indices = @transform_5, window_bounds = array<i64: 128, 128>}, {pipeline_mode = #tpu.pipeline_mode<synchronous>, transform_indices = @transform_6, window_bounds = array<i64: 1, 128>}, {transform_indices = @transform_7, window_bounds = array<i64: 128, 128>}]} {
    %c0_i32 = arith.constant 0 : i32
    %0 = arith.cmpi eq, %arg1, %c0_i32 : i32
    %1 = arith.extui %0 : i1 to i32
    %c0_i32_0 = arith.constant 0 : i32
    %2 = arith.cmpi ne, %1, %c0_i32_0 : i32
    scf.if %2 {
      %cst_10 = arith.constant 0.000000e+00 : f32
      %13 = vector.broadcast %cst_10 : f32 to vector<128x128xf32>
      %c0_11 = arith.constant 0 : index
      %c0_12 = arith.constant 0 : index
      %14 = vector.load %arg10[%c0_11, %c0_12] : memref<128x128xf32, #tpu.memory_space<vmem>>, vector<128x128xf32>
      tpu.vector_store %arg10[%c0_11, %c0_12], %13 {strides = array<i32>} : memref<128x128xf32, #tpu.memory_space<vmem>>, vector<128x128xf32>,
    } else {
    }
    %c0 = arith.constant 0 : index
    %c0_1 = arith.constant 0 : index
    %3 = vector.load %arg3[%c0, %c0_1] : memref<128x128xi8, #tpu.memory_space<vmem>>, vector<128x128xi8>
    %4 = arith.sitofp %3 : vector<128x128xi8> to vector<128x128xbf16>
    %c0_2 = arith.constant 0 : index
    %c0_3 = arith.constant 0 : index
    %5 = vector.load %arg10[%c0_2, %c0_3] : memref<128x128xf32, #tpu.memory_space<vmem>>, vector<128x128xf32>
    %c0_4 = arith.constant 0 : index
    %c0_5 = arith.constant 0 : index
    %6 = vector.load %arg4[%c0_4, %c0_5] : memref<128x128xbf16, #tpu.memory_space<vmem>>, vector<128x128xbf16>
    %cst = arith.constant dense<0.000000e+00> : vector<128x128xf32>
    %7 = tpu.matmul %4, %6, %cst {dimension_numbers = #tpu.dot_dimension_numbers<[1], [0], [0], [1], [0, 0, 1, 1], [], []>} : vector<128x128xbf16>, vector<128x128xbf16>, vector<128x128xf32> -> vector<128x128xf32>
    %8 = arith.addf %5, %7 : vector<128x128xf32>
    %c0_6 = arith.constant 0 : index
    %c0_7 = arith.constant 0 : index
    %9 = vector.load %arg10[%c0_6, %c0_7] : memref<128x128xf32, #tpu.memory_space<vmem>>, vector<128x128xf32>
    tpu.vector_store %arg10[%c0_6, %c0_7], %8 {strides = array<i32>} : memref<128x128xf32, #tpu.memory_space<vmem>>, vector<128x128xf32>,
    %c0_i32_8 = arith.constant 0 : i32
    %10 = arith.cmpi eq, %arg1, %c0_i32_8 : i32
    %11 = arith.extui %10 : i1 to i32
    %c0_i32_9 = arith.constant 0 : i32
    %12 = arith.cmpi ne, %11, %c0_i32_9 : i32
    scf.if %12 {
      %c0_10 = arith.constant 0 : index
      %c0_11 = arith.constant 0 : index
      %13 = vector.load %arg10[%c0_10, %c0_11] : memref<128x128xf32, #tpu.memory_space<vmem>>, vector<128x128xf32>
      %c0_12 = arith.constant 0 : index
      %c0_13 = arith.constant 0 : index
      %14 = vector.load %arg2[%c0_12, %c0_13] : memref<128x1xf32, #tpu.memory_space<vmem>>, vector<128x1xf32>
      %15 = vector.broadcast %14 : vector<128x1xf32> to vector<128x128xf32>
      %16 = arith.mulf %13, %15 : vector<128x128xf32>
      %17 = arith.truncf %16 : vector<128x128xf32> to vector<128x128xbf16>
      %c0_14 = arith.constant 0 : index
      %c0_15 = arith.constant 0 : index
      %18 = vector.load %arg6[%c0_14, %c0_15] : memref<128x128xbf16, #tpu.memory_space<vmem>>, vector<128x128xbf16>
      %cst_16 = arith.constant dense<0.000000e+00> : vector<128x128xf32>
      %19 = tpu.matmul %17, %18, %cst_16 {dimension_numbers = #tpu.dot_dimension_numbers<[1], [0], [0], [1], [0, 0, 1, 1], [], []>} : vector<128x128xbf16>, vector<128x128xbf16>, vector<128x128xf32> -> vector<128x128xf32>
      %c0_17 = arith.constant 0 : index
      %c0_18 = arith.constant 0 : index
      %20 = vector.load %arg5[%c0_17, %c0_18] : memref<128x128xbf16, #tpu.memory_space<vmem>>, vector<128x128xbf16>
      %c0_19 = arith.constant 0 : index
      %c0_20 = arith.constant 0 : index
      %21 = vector.load %arg7[%c0_19, %c0_20] : memref<128x128xbf16, #tpu.memory_space<vmem>>, vector<128x128xbf16>
      %cst_21 = arith.constant dense<0.000000e+00> : vector<128x128xf32>
      %22 = tpu.matmul %20, %21, %cst_21 {dimension_numbers = #tpu.dot_dimension_numbers<[1], [0], [0], [1], [0, 0, 1, 1], [], []>} : vector<128x128xbf16>, vector<128x128xbf16>, vector<128x128xf32> -> vector<128x128xf32>
      %23 = arith.addf %19, %22 : vector<128x128xf32>
      %c0_22 = arith.constant 0 : index
      %c0_23 = arith.constant 0 : index
      %24 = vector.load %arg8[%c0_22, %c0_23] : memref<1x128xf32, #tpu.memory_space<vmem>>, vector<1x128xf32>
      %25 = vector.broadcast %24 : vector<1x128xf32> to vector<128x128xf32>
      %26 = arith.addf %23, %25 : vector<128x128xf32>
      %c0_24 = arith.constant 0 : index
      %c0_25 = arith.constant 0 : index
      %27 = vector.load %arg9[%c0_24, %c0_25] : memref<128x128xf32, #tpu.memory_space<vmem>>, vector<128x128xf32>
      tpu.vector_store %arg9[%c0_24, %c0_25], %26 {strides = array<i32>} : memref<128x128xf32, #tpu.memory_space<vmem>>, vector<128x128xf32>,
    } else {
    }
    return
  }
  func.func @transform_0(%arg0: i32, %arg1: i32) -> (i32, i32) {
    %c0_i32 = arith.constant 0 : i32
    %c0_i32_0 = arith.constant 0 : i32
    return %arg0, %c0_i32 : i32, i32
  }
  func.func @transform_1(%arg0: i32, %arg1: i32) -> (i32, i32) {
    %c0_i32 = arith.constant 0 : i32
    return %arg0, %arg1 : i32, i32
  }
  func.func @transform_2(%arg0: i32, %arg1: i32) -> (i32, i32) {
    %c0_i32 = arith.constant 0 : i32
    %c0_i32_0 = arith.constant 0 : i32
    return %arg1, %c0_i32 : i32, i32
  }
  func.func @transform_3(%arg0: i32, %arg1: i32) -> (i32, i32) {
    %c0_i32 = arith.constant 0 : i32
    %c0_i32_0 = arith.constant 0 : i32
    return %arg0, %c0_i32 : i32, i32
  }
  func.func @transform_4(%arg0: i32, %arg1: i32) -> (i32, i32) {
    %c0_i32 = arith.constant 0 : i32
    %c0_i32_0 = arith.constant 0 : i32
    %c0_i32_1 = arith.constant 0 : i32
    return %c0_i32, %c0_i32_0 : i32, i32
  }
  func.func @transform_5(%arg0: i32, %arg1: i32) -> (i32, i32) {
    %c0_i32 = arith.constant 0 : i32
    %c0_i32_0 = arith.constant 0 : i32
    %c0_i32_1 = arith.constant 0 : i32
    return %c0_i32, %c0_i32_0 : i32, i32
  }
  func.func @transform_6(%arg0: i32, %arg1: i32) -> (i32, i32) {
    %c0_i32 = arith.constant 0 : i32
    %c0_i32_0 = arith.constant 0 : i32
    %c0_i32_1 = arith.constant 0 : i32
    return %c0_i32, %c0_i32_0 : i32, i32
  }
  func.func @transform_7(%arg0: i32, %arg1: i32) -> (i32, i32) {
    %c0_i32 = arith.constant 0 : i32
    %c0_i32_0 = arith.constant 0 : i32
    return %arg0, %c0_i32 : i32, i32
  }
}

module attributes {stable_mosaic.version = 11 : i64} {
  func.func @_sage_layer_kernel(%arg0: i32, %arg1: i32, %arg2: memref<128x1xf32, #tpu.memory_space<vmem>>, %arg3: memref<128x128xi8, #tpu.memory_space<vmem>>, %arg4: memref<128x128xbf16, #tpu.memory_space<vmem>>, %arg5: memref<128x128xbf16, #tpu.memory_space<vmem>>, %arg6: memref<128x128xbf16, #tpu.memory_space<vmem>>, %arg7: memref<128x128xbf16, #tpu.memory_space<vmem>>, %arg8: memref<1x128xf32, #tpu.memory_space<vmem>>, %arg9: memref<128x128xbf16, #tpu.memory_space<vmem>>, %arg10: memref<128x128xf32, #tpu.memory_space<vmem>>) attributes {dimension_semantics = [#tpu.dimension_semantics<parallel>, #tpu.dimension_semantics<arbitrary>], iteration_bounds = array<i64: 1, 1>, scalar_prefetch = 0 : i64, scratch_operands = 1 : i64, tpu.core_type = #tpu.core_type<tc>, window_params = [{transform_indices = @transform_0, window_bounds = array<i64: 128, 1>}, {transform_indices = @transform_1, window_bounds = array<i64: 128, 128>}, {transform_indices = @transform_2, window_bounds = array<i64: 128, 128>}, {transform_indices = @transform_3, window_bounds = array<i64: 128, 128>}, {pipeline_mode = #tpu.pipeline_mode<synchronous>, transform_indices = @transform_4, window_bounds = array<i64: 128, 128>}, {pipeline_mode = #tpu.pipeline_mode<synchronous>, transform_indices = @transform_5, window_bounds = array<i64: 128, 128>}, {pipeline_mode = #tpu.pipeline_mode<synchronous>, transform_indices = @transform_6, window_bounds = array<i64: 1, 128>}, {transform_indices = @transform_7, window_bounds = array<i64: 128, 128>}]} {
    %c0_i32 = arith.constant 0 : i32
    %0 = arith.cmpi eq, %arg1, %c0_i32 : i32
    %1 = arith.extui %0 : i1 to i32
    %c0_i32_0 = arith.constant 0 : i32
    %2 = arith.cmpi ne, %1, %c0_i32_0 : i32
    scf.if %2 {
      %cst_10 = arith.constant 0.000000e+00 : f32
      %13 = vector.broadcast %cst_10 : f32 to vector<128x128xf32>
      %c0_11 = arith.constant 0 : index
      %c0_12 = arith.constant 0 : index
      %14 = vector.load %arg10[%c0_11, %c0_12] : memref<128x128xf32, #tpu.memory_space<vmem>>, vector<128x128xf32>
      tpu.vector_store %arg10[%c0_11, %c0_12], %13 {strides = array<i32>} : memref<128x128xf32, #tpu.memory_space<vmem>>, vector<128x128xf32>,
    } else {
    }
    %c0 = arith.constant 0 : index
    %c0_1 = arith.constant 0 : index
    %3 = vector.load %arg3[%c0, %c0_1] : memref<128x128xi8, #tpu.memory_space<vmem>>, vector<128x128xi8>
    %4 = arith.sitofp %3 : vector<128x128xi8> to vector<128x128xbf16>
    %c0_2 = arith.constant 0 : index
    %c0_3 = arith.constant 0 : index
    %5 = vector.load %arg10[%c0_2, %c0_3] : memref<128x128xf32, #tpu.memory_space<vmem>>, vector<128x128xf32>
    %c0_4 = arith.constant 0 : index
    %c0_5 = arith.constant 0 : index
    %6 = vector.load %arg4[%c0_4, %c0_5] : memref<128x128xbf16, #tpu.memory_space<vmem>>, vector<128x128xbf16>
    %cst = arith.constant dense<0.000000e+00> : vector<128x128xf32>
    %7 = tpu.matmul %4, %6, %cst {dimension_numbers = #tpu.dot_dimension_numbers<[1], [0], [0], [1], [0, 0, 1, 1], [], []>} : vector<128x128xbf16>, vector<128x128xbf16>, vector<128x128xf32> -> vector<128x128xf32>
    %8 = arith.addf %5, %7 : vector<128x128xf32>
    %c0_6 = arith.constant 0 : index
    %c0_7 = arith.constant 0 : index
    %9 = vector.load %arg10[%c0_6, %c0_7] : memref<128x128xf32, #tpu.memory_space<vmem>>, vector<128x128xf32>
    tpu.vector_store %arg10[%c0_6, %c0_7], %8 {strides = array<i32>} : memref<128x128xf32, #tpu.memory_space<vmem>>, vector<128x128xf32>,
    %c0_i32_8 = arith.constant 0 : i32
    %10 = arith.cmpi eq, %arg1, %c0_i32_8 : i32
    %11 = arith.extui %10 : i1 to i32
    %c0_i32_9 = arith.constant 0 : i32
    %12 = arith.cmpi ne, %11, %c0_i32_9 : i32
    scf.if %12 {
      %c0_10 = arith.constant 0 : index
      %c0_11 = arith.constant 0 : index
      %13 = vector.load %arg10[%c0_10, %c0_11] : memref<128x128xf32, #tpu.memory_space<vmem>>, vector<128x128xf32>
      %c0_12 = arith.constant 0 : index
      %c0_13 = arith.constant 0 : index
      %14 = vector.load %arg2[%c0_12, %c0_13] : memref<128x1xf32, #tpu.memory_space<vmem>>, vector<128x1xf32>
      %15 = vector.broadcast %14 : vector<128x1xf32> to vector<128x128xf32>
      %16 = arith.mulf %13, %15 : vector<128x128xf32>
      %17 = arith.truncf %16 : vector<128x128xf32> to vector<128x128xbf16>
      %c0_14 = arith.constant 0 : index
      %c0_15 = arith.constant 0 : index
      %18 = vector.load %arg6[%c0_14, %c0_15] : memref<128x128xbf16, #tpu.memory_space<vmem>>, vector<128x128xbf16>
      %cst_16 = arith.constant dense<0.000000e+00> : vector<128x128xf32>
      %19 = tpu.matmul %17, %18, %cst_16 {dimension_numbers = #tpu.dot_dimension_numbers<[1], [0], [0], [1], [0, 0, 1, 1], [], []>} : vector<128x128xbf16>, vector<128x128xbf16>, vector<128x128xf32> -> vector<128x128xf32>
      %c0_17 = arith.constant 0 : index
      %c0_18 = arith.constant 0 : index
      %20 = vector.load %arg5[%c0_17, %c0_18] : memref<128x128xbf16, #tpu.memory_space<vmem>>, vector<128x128xbf16>
      %c0_19 = arith.constant 0 : index
      %c0_20 = arith.constant 0 : index
      %21 = vector.load %arg7[%c0_19, %c0_20] : memref<128x128xbf16, #tpu.memory_space<vmem>>, vector<128x128xbf16>
      %cst_21 = arith.constant dense<0.000000e+00> : vector<128x128xf32>
      %22 = tpu.matmul %20, %21, %cst_21 {dimension_numbers = #tpu.dot_dimension_numbers<[1], [0], [0], [1], [0, 0, 1, 1], [], []>} : vector<128x128xbf16>, vector<128x128xbf16>, vector<128x128xf32> -> vector<128x128xf32>
      %23 = arith.addf %19, %22 : vector<128x128xf32>
      %c0_22 = arith.constant 0 : index
      %c0_23 = arith.constant 0 : index
      %24 = vector.load %arg8[%c0_22, %c0_23] : memref<1x128xf32, #tpu.memory_space<vmem>>, vector<1x128xf32>
      %25 = vector.broadcast %24 : vector<1x128xf32> to vector<128x128xf32>
      %26 = arith.addf %23, %25 : vector<128x128xf32>
      %cst_24 = arith.constant 0.000000e+00 : f32
      %27 = vector.broadcast %cst_24 : f32 to vector<128x128xf32>
      %28 = arith.maximumf %26, %27 : vector<128x128xf32>
      %29 = arith.truncf %28 : vector<128x128xf32> to vector<128x128xbf16>
      %c0_25 = arith.constant 0 : index
      %c0_26 = arith.constant 0 : index
      %30 = vector.load %arg9[%c0_25, %c0_26] : memref<128x128xbf16, #tpu.memory_space<vmem>>, vector<128x128xbf16>
      tpu.vector_store %arg9[%c0_25, %c0_26], %29 {strides = array<i32>} : memref<128x128xbf16, #tpu.memory_space<vmem>>, vector<128x128xbf16>,
    } else {
    }
    return
  }
  func.func @transform_0(%arg0: i32, %arg1: i32) -> (i32, i32) {
    %c0_i32 = arith.constant 0 : i32
    %c0_i32_0 = arith.constant 0 : i32
    return %arg0, %c0_i32 : i32, i32
  }
  func.func @transform_1(%arg0: i32, %arg1: i32) -> (i32, i32) {
    %c0_i32 = arith.constant 0 : i32
    return %arg0, %arg1 : i32, i32
  }
  func.func @transform_2(%arg0: i32, %arg1: i32) -> (i32, i32) {
    %c0_i32 = arith.constant 0 : i32
    %c0_i32_0 = arith.constant 0 : i32
    return %arg1, %c0_i32 : i32, i32
  }
  func.func @transform_3(%arg0: i32, %arg1: i32) -> (i32, i32) {
    %c0_i32 = arith.constant 0 : i32
    %c0_i32_0 = arith.constant 0 : i32
    return %arg0, %c0_i32 : i32, i32
  }
  func.func @transform_4(%arg0: i32, %arg1: i32) -> (i32, i32) {
    %c0_i32 = arith.constant 0 : i32
    %c0_i32_0 = arith.constant 0 : i32
    %c0_i32_1 = arith.constant 0 : i32
    return %c0_i32, %c0_i32_0 : i32, i32
  }
  func.func @transform_5(%arg0: i32, %arg1: i32) -> (i32, i32) {
    %c0_i32 = arith.constant 0 : i32
    %c0_i32_0 = arith.constant 0 : i32
    %c0_i32_1 = arith.constant 0 : i32
    return %c0_i32, %c0_i32_0 : i32, i32
  }
  func.func @transform_6(%arg0: i32, %arg1: i32) -> (i32, i32) {
    %c0_i32 = arith.constant 0 : i32
    %c0_i32_0 = arith.constant 0 : i32
    %c0_i32_1 = arith.constant 0 : i32
    return %c0_i32, %c0_i32_0 : i32, i32
  }
  func.func @transform_7(%arg0: i32, %arg1: i32) -> (i32, i32) {
    %c0_i32 = arith.constant 0 : i32
    %c0_i32_0 = arith.constant 0 : i32
    return %arg0, %c0_i32 : i32, i32
  }
}

</mosaic_0001>

<bundles_post_ra>
// kernel: link_prediction_gnn_forward.3
= control target key start
LH: loop header
LB: loop body
LE: loop exit
PB: predicated region body
PF: predicated region fallthrough
CT: control target
= control target key end

     0   :  { %v1080_v1 = vmov 0   ;;  %s1332_s2 = inlined_call_operand.vmem [shape: bf16[128,128], index: 2, kind: input, shape index: {}, may-alias: {2,3}]   ;;  %s1333_s1 = inlined_call_operand.vmem [shape: s8[128,128], index: 1, kind: input, shape index: {}]   ;;  %s1334_s0 = inlined_call_operand.vmem [shape: f32[128,1], index: 0, kind: input, shape index: {}]   ;;  %s1335_s5 = inlined_call_operand.vmem [shape: bf16[128,128], index: 5, kind: input, shape index: {}]   ;;  %s1336_s4 = inlined_call_operand.vmem [shape: bf16[128,128], index: 4, kind: input, shape index: {}]   ;;  %s1337_s3 = inlined_call_operand.vmem [shape: bf16[128,128], index: 3, kind: input, shape index: {}, may-alias: {2,3}]   ;;  %s1338_s6 = inlined_call_operand.vmem [shape: f32[1,128], index: 6, kind: input, shape index: {}]   ;;  %s1339_s7 = inlined_call_operand.vmem [shape: f32[128,128], index: 7, kind: output, shape index: {}]  }
   0x1   :  { %v1048_v0 = vld [vmem:[%s1332_s2] sm:$0xff]   ;;  %1047 = vset.pattern.permute.xlu1 %v1080_v1  ;;  %1046 = vset.pattern.permute.xlu0 %v1080_v1  ;;  %v1049_v2 = vld [vmem:[%s1332_s2 + $0x8] sm:$0xff]   ;;  %v1050_v3 = vld [vmem:[%s1332_s2 + $0x10] sm:$0xff]  }
   0x2   :  { %917 = vmatprep.subr.bf16.mxu0 %v1048_v0  ;;  %v1051_v4 = vld [vmem:[%s1332_s2 + $0x18] sm:$0xff]   ;;  %v1136_v5 = vld [vmem:[%s1333_s1] sm:$0xff]  ;;  %v289_v7 = vld [vmem:[%s1334_s0 + $0x10] sm:$0xff] }
   0x3   :  { %918 = vmatpush3.bf16.msra.mxu0 %v1048_v0  ;;  %v51_v6 = vunpack.c.l.s8.bf16 %v1136_v5  ;;  %v287_v8 = vld [vmem:[%s1334_s0] sm:$0xff]  ;;  %315 = vperm.xlu1 %1047, %v289_v7   ;;  %v290_v9 = vld [vmem:[%s1334_s0 + $0x18] sm:$0xff]  ;;  %v288_v10 = vld [vmem:[%s1334_s0 + $0x8] sm:$0xff]  ;;  %v52_v32 = vunpack.c.h.s8.bf16 %v1136_v5 }
   0x4   :  { %919 = vmatprep.subr.bf16.mxu0 %v1049_v2  ;;  %305 = vperm.xlu0 %1046, %v287_v8   ;;  %v1052_v11 = vld [vmem:[%s1332_s2 + $0x20] sm:$0xff]   ;;  %v1053_v12 = vld [vmem:[%s1332_s2 + $0x28] sm:$0xff]   ;;  %v1054_v17 = vld [vmem:[%s1332_s2 + $0x30] sm:$0xff]  }
   0x5   :  { %933 = vmatprep.mubr.bf16.mxu0 %v51_v6  ;;  %v296_v13 = vld [vmem:[%s1334_s0 + $0x48] sm:$0xff]  ;;  %v295_v14 = vld [vmem:[%s1334_s0 + $0x40] sm:$0xff]  ;;  %v298_v18 = vld [vmem:[%s1334_s0 + $0x58] sm:$0xff] }
   0x6   :  { %v1056_v15 = vld [vmem:[%s1335_s5] sm:$0xff]   ;;  %v1057_v16 = vld [vmem:[%s1335_s5 + $0x8] sm:$0xff]   ;;  %v297_v19 = vld [vmem:[%s1334_s0 + $0x50] sm:$0xff] }
   0x7   :  { %920 = vmatpush3.bf16.msra.mxu0 %v1049_v2  ;;  %320 = vperm.xlu1 %1047, %v290_v9   ;;  %v1058_v20 = vld [vmem:[%s1335_s5 + $0x10] sm:$0xff]   ;;  %v1055_v21 = vld [vmem:[%s1332_s2 + $0x38] sm:$0xff]   ;;  %v292_v22 = vld [vmem:[%s1334_s0 + $0x28] sm:$0xff] }
   0x8   :  { %921 = vmatprep.subr.bf16.mxu0 %v1050_v3  ;;  %310 = vperm.xlu0 %1046, %v288_v10   ;;  %v291_v23 = vld [vmem:[%s1334_s0 + $0x20] sm:$0xff]  ;;  %v1059_v24 = vld [vmem:[%s1335_s5 + $0x18] sm:$0xff]   ;;  %v293_v26 = vld [vmem:[%s1334_s0 + $0x30] sm:$0xff] }
   0x9   :  { %949 = vmatprep.subr.bf16.mxu1 %v1056_v15  ;;  %v294_v25 = vld [vmem:[%s1334_s0 + $0x38] sm:$0xff]  ;;  %v48_v27 = vld [vmem:[%s1333_s1 + $0x8] sm:$0xff]  ;;  %v1067_v28 = vld [vmem:[%s1337_s3] sm:$0xff]  }
   0xa   :  { %950 = vmatpush3.bf16.msra.mxu1 %v1056_v15  ;;  %v1060_v29 = vld [vmem:[%s1335_s5 + $0x20] sm:$0xff]   ;;  %v300_v31 = vld [vmem:[%s1334_s0 + $0x68] sm:$0xff]  ;;  %965 = vmatprep.mubr.bf16.mxu1 %v1067_v28  ;;  %v53_v34 = vunpack.c.l.s8.bf16 %v48_v27  ;;  %v49_v37 = vld [vmem:[%s1333_s1 + $0x10] sm:$0xff]  ;;  %v54_v42 = vunpack.c.h.s8.bf16 %v48_v27 }
   0xb   :  { %922 = vmatpush3.bf16.msra.mxu0 %v1050_v3  ;;  %350 = vperm.xlu1 %1047, %v296_v13   ;;  %v1061_v30 = vld [vmem:[%s1336_s4] sm:$0xff]   ;;  %v1062_v35 = vld [vmem:[%s1335_s5 + $0x28] sm:$0xff]   ;;  %v302_v38 = vld [vmem:[%s1334_s0 + $0x78] sm:$0xff]  ;;  %v55_v43 = vunpack.c.l.s8.bf16 %v49_v37  ;;  %v56_v48 = vunpack.c.h.s8.bf16 %v49_v37 }
   0xc   :  { %923 = vmatprep.subr.bf16.mxu0 %v1051_v4  ;;  %345 = vperm.xlu0 %1046, %v295_v14   ;;  %v299_v33 = vld [vmem:[%s1334_s0 + $0x60] sm:$0xff]  ;;  %v1063_v36 = vld [vmem:[%s1336_s4 + $0x8] sm:$0xff]   ;;  %v301_v39 = vld [vmem:[%s1334_s0 + $0x70] sm:$0xff] }
   0xd   :  { %951 = vmatprep.subr.bf16.mxu1 %v1057_v16  ;;  %v1064_v40 = vld [vmem:[%s1335_s5 + $0x30] sm:$0xff]   ;;  %v1066_v44 = vld [vmem:[%s1335_s5 + $0x38] sm:$0xff]   ;;  %v1070_v47 = vld [vmem:[%s1336_s4 + $0x20] sm:$0xff]  }
   0xe   :  { %952 = vmatpush3.bf16.msra.mxu1 %v1057_v16  ;;  %v1065_v41 = vld [vmem:[%s1336_s4 + $0x10] sm:$0xff]   ;;  %v1068_v45 = vld [vmem:[%s1336_s4 + $0x18] sm:$0xff]   ;;  %v1069_v50 = vld [vmem:[%s1337_s3 + $0x8] sm:$0xff]  }
   0xf   :  { %924 = vmatpush3.bf16.msra.mxu0 %v1051_v4  ;;  %360 = vperm.xlu1 %1047, %v298_v18   ;;  %v50_v46 = vld [vmem:[%s1333_s1 + $0x18] sm:$0xff]  ;;  %v1071_v51 = vld [vmem:[%s1337_s3 + $0x10] sm:$0xff]   ;;  %v1072_v52 = vld [vmem:[%s1336_s4 + $0x28] sm:$0xff]  }
  0x10   :  { %925 = vmatprep.subr.bf16.mxu0 %v1052_v11  ;;  %355 = vperm.xlu0 %1046, %v297_v19   ;;  %v57_v49 = vunpack.c.l.s8.bf16 %v50_v46  ;;  %v58_v53 = vunpack.c.h.s8.bf16 %v50_v46  ;;  %v1073_v54 = vld [vmem:[%s1337_s3 + $0x18] sm:$0xff]   ;;  %v1074_v55 = vld [vmem:[%s1336_s4 + $0x30] sm:$0xff]   ;;  %v1076_v57 = vld [vmem:[%s1337_s3 + $0x20] sm:$0xff]  }
  0x11   :  { %953 = vmatprep.subr.bf16.mxu1 %v1058_v20  ;;  %v1075_v56 = vld [vmem:[%s1336_s4 + $0x38] sm:$0xff]   ;;  %v1077_v58 = vld [vmem:[%s1337_s3 + $0x28] sm:$0xff]   ;;  %v1078_v59 = vld [vmem:[%s1337_s3 + $0x30] sm:$0xff]  }
  0x12   :  { %954 = vmatpush3.bf16.msra.mxu1 %v1058_v20  ;;  %v1079_v60 = vld [vmem:[%s1337_s3 + $0x38] sm:$0xff]  }
  0x13   :  { %926 = vmatpush3.bf16.msra.mxu0 %v1052_v11  ;;  %330 = vperm.xlu1 %1047, %v292_v22  }
  0x14   :  { %927 = vmatprep.subr.bf16.mxu0 %v1053_v12  ;;  %325 = vperm.xlu0 %1046, %v291_v23  }
  0x15   :  { %955 = vmatprep.subr.bf16.mxu1 %v1059_v24 }
  0x16   :  { %956 = vmatpush3.bf16.msra.mxu1 %v1059_v24 }
  0x17   :  { %928 = vmatpush3.bf16.msra.mxu0 %v1053_v12  ;;  %340 = vperm.xlu1 %1047, %v294_v25  }
  0x18   :  { %929 = vmatprep.subr.bf16.mxu0 %v1054_v17  ;;  %335 = vperm.xlu0 %1046, %v293_v26  }
  0x19   :  { %957 = vmatprep.subr.bf16.mxu1 %v1060_v29 }
  0x1a   :  { %958 = vmatpush3.bf16.msra.mxu1 %v1060_v29 }
  0x1b   :  { %930 = vmatpush3.bf16.msra.mxu0 %v1054_v17  ;;  %370 = vperm.xlu1 %1047, %v300_v31  }
  0x1c   :  { %931 = vmatprep.subr.bf16.mxu0 %v1055_v21  ;;  %365 = vperm.xlu0 %1046, %v299_v33  }
  0x1d   :  { %959 = vmatprep.subr.bf16.mxu1 %v1062_v35 }
  0x1e   :  { %960 = vmatpush3.bf16.msra.mxu1 %v1062_v35 }
  0x1f   :  { %932 = vmatpush3.bf16.msra.mxu0 %v1055_v21  ;;  %380 = vperm.xlu1 %1047, %v302_v38  }
  0x20   :  { %981 = vmatprep.subr.bf16.mxu0 %v1061_v30  ;;  %375 = vperm.xlu0 %1046, %v301_v39  }
  0x21   :  { %961 = vmatprep.subr.bf16.mxu1 %v1064_v40 }
  0x22   :  { %934 = vmatmul.mubr.bf16.vlgmr.msra.gmra.mrb[0].mxu0 %v52_v32  ;;  %962 = vmatpush3.bf16.msra.mxu1 %v1064_v40 }
  0x23   :  { %937 = vmatprep.mubr.bf16.mxu0 %v53_v34  ;;  %982 = vmatpush3.bf16.msra.mxu0 %v1061_v30 }
  0x24   :  { %983 = vmatprep.subr.bf16.mxu0 %v1063_v36  ;;  %963 = vmatprep.subr.bf16.mxu1 %v1066_v44 }
  0x26   :  { %964 = vmatpush3.bf16.msra.mxu1 %v1066_v44 }
  0x27   :  { %984 = vmatpush3.bf16.msra.mxu0 %v1063_v36  ;;  %1013 = vmatprep.subr.bf16.mxu1 %v1061_v30 }
  0x28   :  { %985 = vmatprep.subr.bf16.mxu0 %v1065_v41 }
  0x29   :  { %966 = vmatmul.mubr.bf16.vlgmr.msra.gmra.mrb[0].mxu1 %v1069_v50 }
  0x2a   :  { %938 = vmatmul.mubr.bf16.gmra.mrb[4].mxu0 %v54_v42  ;;  %1021 = vmatpush3.bf16.msra.mxu1 %v1061_v30 }
  0x2b   :  { %941 = vmatprep.mubr.bf16.mxu0 %v55_v43  ;;  %986 = vmatpush3.bf16.msra.mxu0 %v1065_v41 }
  0x2c   :  { %987 = vmatprep.subr.bf16.mxu0 %v1068_v45  ;;  %1014 = vmatprep.subr.bf16.mxu1 %v1063_v36 }
  0x2d   :  { %969 = vmatprep.mubr.bf16.mxu1 %v1071_v51 }
  0x2e   :  { %1022 = vmatpush3.bf16.msra.mxu1 %v1063_v36 }
  0x2f   :  { %988 = vmatpush3.bf16.msra.mxu0 %v1068_v45  ;;  %1015 = vmatprep.subr.bf16.mxu1 %v1065_v41 }
  0x30   :  { %989 = vmatprep.subr.bf16.mxu0 %v1070_v47 }
  0x31   :  { %970 = vmatmul.mubr.bf16.gmra.mrb[4].mxu1 %v1073_v54 }
  0x32   :  { %942 = vmatmul.mubr.bf16.gmra.mrb[8].mxu0 %v56_v48  ;;  %1023 = vmatpush3.bf16.msra.mxu1 %v1065_v41 }
  0x33   :  { %945 = vmatprep.mubr.bf16.mxu0 %v57_v49  ;;  %990 = vmatpush3.bf16.msra.mxu0 %v1070_v47 }
  0x34   :  { %991 = vmatprep.subr.bf16.mxu0 %v1072_v52  ;;  %1016 = vmatprep.subr.bf16.mxu1 %v1068_v45 }
  0x35   :  { %973 = vmatprep.mubr.bf16.mxu1 %v1076_v57 }
  0x36   :  { %1024 = vmatpush3.bf16.msra.mxu1 %v1068_v45 }
  0x37   :  { %992 = vmatpush3.bf16.msra.mxu0 %v1072_v52  ;;  %1017 = vmatprep.subr.bf16.mxu1 %v1070_v47 }
  0x38   :  { %993 = vmatprep.subr.bf16.mxu0 %v1074_v55 }
  0x39   :  { %974 = vmatmul.mubr.bf16.gmra.mrb[8].mxu1 %v1077_v58 }
  0x3a   :  { %946 = vmatmul.mubr.bf16.gmra.mrb[12].mxu0 %v58_v53  ;;  %1025 = vmatpush3.bf16.msra.mxu1 %v1070_v47 }
  0x3b   :  { %1018 = vmatprep.subr.bf16.mxu1 %v1072_v52  ;;  %994 = vmatpush3.bf16.msra.mxu0 %v1074_v55 }
  0x3c   :  { %995 = vmatprep.subr.bf16.mxu0 %v1075_v56  ;;  %977 = vmatprep.mubr.bf16.mxu1 %v1078_v59 }
  0x3e   :  { %1026 = vmatpush3.bf16.msra.mxu1 %v1072_v52 }
  0x3f   :  { %1019 = vmatprep.subr.bf16.mxu1 %v1074_v55  ;;  %996 = vmatpush3.bf16.msra.mxu0 %v1075_v56 }
  0x41   :  { %978 = vmatmul.mubr.bf16.gmra.mrb[12].mxu1 %v1079_v60 }
  0x42   :  { %1027 = vmatpush3.bf16.msra.mxu1 %v1074_v55 }
  0x43   :  { %1020 = vmatprep.subr.bf16.mxu1 %v1075_v56 }
  0x46   :  { %1028 = vmatpush3.bf16.msra.mxu1 %v1075_v56 }
  0x82   :  { %v316_v61 = vpop.permute.xlu1 %315 }
  0x83   :  { %v306_v62 = vpop.permute.xlu0 %305 }
  0x86   :  { %v321_v63 = vpop.permute.xlu1 %320 }
  0x87   :  { %v311_v0 = vpop.permute.xlu0 %310 }
  0x8a   :  { %v351_v1 = vpop.permute.xlu1 %350 }
  0x8b   :  { %v346_v2 = vpop.permute.xlu0 %345 }
  0x8e   :  { %v361_v3 = vpop.permute.xlu1 %360 }
  0x8f   :  { %v356_v4 = vpop.permute.xlu0 %355 }
  0x92   :  { %v331_v8 = vpop.permute.xlu1 %330 }
  0x93   :  { %v326_v12 = vpop.permute.xlu0 %325 }
  0x96   :  { %v341_v18 = vpop.permute.xlu1 %340 }
  0x97   :  { %v336_v20 = vpop.permute.xlu0 %335 }
  0x9a   :  { %v371_v29 = vpop.permute.xlu1 %370 }
  0x9b   :  { %v366_v30 = vpop.permute.xlu0 %365 }
  0x9e   :  { %v381_v45 = vpop.permute.xlu1 %380 }
  0x9f   :  { %v376_v46 = vpop.permute.xlu0 %375 }
  0xf5   :  { %v935_v5 = vpop.f32.mrb[0].mxu0 }
  0xf6   :  { %v173_v6 = vpop.f32.mrb[1].mxu0  ;;  %v385_v9 = vmul.f32 %v935_v5, %v316_v61 }
  0xf7   :  { %v936_v7 = vpop.f32.mrb[2].mxu0  ;;  %v383_v13 = vmul.f32 %v306_v62, %v173_v6  ;;  %v868_v62 = vld [vmem:[%s1338_s6] ss:$0 sm:$0xff] }
  0xf8   :  { %v386_v10 = vmul.f32 %v936_v7, %v321_v63  ;;  %v176_v11 = vpop.f32.mrb[3].mxu0 }
  0xf9   :  { %v384_v14 = vmul.f32 %v311_v0, %v176_v11 }
  0xfa   :  { %v400_v15 = vpack.c.bf16 %v386_v10, %v385_v9 }
  0xfb   :  { %v399_v16 = vpack.c.bf16 %v384_v14, %v383_v13 }
  0xfc   :  { %v967_v33 = vpop.f32.mrb[0].mxu1 }
  0xfd   :  { %v939_v17 = vpop.f32.mrb[4].mxu0  ;;  %997 = vmatprep.mubr.bf16.mxu0 %v399_v16  ;;  %v585_v35 = vpop.f32.mrb[1].mxu1 }
  0xfe   :  { %v189_v19 = vpop.f32.mrb[5].mxu0  ;;  %998 = vmatmul.mubr.bf16.vlgmr.msra.gmra.mrb[16].mxu0 %v400_v15  ;;  %v389_v22 = vmul.f32 %v939_v17, %v336_v20  ;;  %v968_v39 = vpop.f32.mrb[2].mxu1 }
  0xff   :  { %v940_v21 = vpop.f32.mrb[6].mxu0  ;;  %v387_v25 = vmul.f32 %v326_v12, %v189_v19  ;;  %v588_v42 = vpop.f32.mrb[3].mxu1 }
 0x100   :  { %v390_v23 = vmul.f32 %v940_v21, %v341_v18  ;;  %v192_v24 = vpop.f32.mrb[7].mxu0 }
 0x101   :  { %v388_v26 = vmul.f32 %v331_v8, %v192_v24 }
 0x102   :  { %v402_v27 = vpack.c.bf16 %v390_v23, %v389_v22 }
 0x103   :  { %v401_v28 = vpack.c.bf16 %v388_v26, %v387_v25 }
 0x104   :  { %v971_v49 = vpop.f32.mrb[4].mxu1 }
 0x105   :  { %v943_v31 = vpop.f32.mrb[8].mxu0  ;;  %1001 = vmatprep.mubr.bf16.mxu0 %v401_v28  ;;  %v601_v51 = vpop.f32.mrb[5].mxu1 }
 0x106   :  { %v205_v32 = vpop.f32.mrb[9].mxu0  ;;  %1002 = vmatmul.mubr.bf16.gmra.mrb[20].mxu0 %v402_v27  ;;  %v393_v36 = vmul.f32 %v943_v31, %v356_v4  ;;  %v972_v55 = vpop.f32.mrb[6].mxu1 }
 0x107   :  { %v944_v34 = vpop.f32.mrb[10].mxu0  ;;  %v391_v40 = vmul.f32 %v346_v2, %v205_v32  ;;  %v604_v58 = vpop.f32.mrb[7].mxu1 }
 0x108   :  { %v394_v37 = vmul.f32 %v944_v34, %v361_v3  ;;  %v208_v38 = vpop.f32.mrb[11].mxu0 }
 0x109   :  { %v392_v41 = vmul.f32 %v351_v1, %v208_v38 }
 0x10a   :  { %v404_v43 = vpack.c.bf16 %v394_v37, %v393_v36 }
 0x10b   :  { %v403_v44 = vpack.c.bf16 %v392_v41, %v391_v40 }
 0x10d   :  { %v947_v47 = vpop.f32.mrb[12].mxu0  ;;  %1005 = vmatprep.mubr.bf16.mxu1 %v403_v44 }
 0x10e   :  { %v221_v48 = vpop.f32.mrb[13].mxu0  ;;  %1006 = vmatmul.mubr.bf16.vlgmr.msra.gmra.mrb[8].mxu1 %v404_v43  ;;  %v397_v52 = vmul.f32 %v947_v47, %v376_v46 }
 0x10f   :  { %v948_v50 = vpop.f32.mrb[14].mxu0  ;;  %v395_v56 = vmul.f32 %v366_v30, %v221_v48 }
 0x110   :  { %v398_v53 = vmul.f32 %v948_v50, %v381_v45  ;;  %v224_v54 = vpop.f32.mrb[15].mxu0 }
 0x111   :  { %v396_v57 = vmul.f32 %v371_v29, %v224_v54 }
 0x112   :  { %v406_v59 = vpack.c.bf16 %v398_v53, %v397_v52 }
 0x113   :  { %v405_v60 = vpack.c.bf16 %v396_v57, %v395_v56 }
 0x115   :  { %1009 = vmatprep.mubr.bf16.mxu1 %v405_v60 }
 0x116   :  { %1010 = vmatmul.mubr.bf16.gmra.mrb[12].mxu1 %v406_v59 }
 0x1d1   :  { %v999_v61 = vpop.f32.mrb[16].mxu0 }
 0x1d2   :  { %v739_v63 = vadd.f32 %v999_v61, %v967_v33  ;;  %v730_v0 = vpop.f32.mrb[17].mxu0 }
 0x1d3   :  { %v731_v1 = vadd.f32 %v730_v0, %v585_v35  ;;  %v1000_v2 = vpop.f32.mrb[18].mxu0 }
 0x1d4   :  { %v802_v3 = vadd.f32 %v868_v62, %v739_v63  ;;  %v742_v4 = vadd.f32 %v1000_v2, %v968_v39  ;;  %v733_v5 = vpop.f32.mrb[19].mxu0 }
 0x1d5   :  { %v800_v6 = vadd.f32 %v868_v62, %v731_v1  ;;  %v734_v7 = vadd.f32 %v733_v5, %v588_v42 }
 0x1d6   :  { %818 = vst [vmem:[%s1339_s7 + $0x10] sm:$0xff] %v802_v3  ;;  %v803_v8 = vadd.f32 %v868_v62, %v742_v4 }
 0x1d7   :  { %816 = vst [vmem:[%s1339_s7] sm:$0xff] %v800_v6  ;;  %v801_v9 = vadd.f32 %v868_v62, %v734_v7 }
 0x1d8   :  { %819 = vst [vmem:[%s1339_s7 + $0x18] sm:$0xff] %v803_v8 }
 0x1d9   :  { %817 = vst [vmem:[%s1339_s7 + $0x8] sm:$0xff] %v801_v9  ;;  %v1003_v10 = vpop.f32.mrb[20].mxu0 }
 0x1da   :  { %v755_v11 = vadd.f32 %v1003_v10, %v971_v49  ;;  %v746_v12 = vpop.f32.mrb[21].mxu0 }
 0x1db   :  { %v747_v13 = vadd.f32 %v746_v12, %v601_v51  ;;  %v1004_v14 = vpop.f32.mrb[22].mxu0 }
 0x1dc   :  { %v806_v15 = vadd.f32 %v868_v62, %v755_v11  ;;  %v758_v16 = vadd.f32 %v1004_v14, %v972_v55  ;;  %v749_v17 = vpop.f32.mrb[23].mxu0 }
 0x1dd   :  { %v804_v18 = vadd.f32 %v868_v62, %v747_v13  ;;  %v750_v19 = vadd.f32 %v749_v17, %v604_v58 }
 0x1de   :  { %822 = vst [vmem:[%s1339_s7 + $0x30] sm:$0xff] %v806_v15  ;;  %v807_v20 = vadd.f32 %v868_v62, %v758_v16 }
 0x1df   :  { %820 = vst [vmem:[%s1339_s7 + $0x20] sm:$0xff] %v804_v18  ;;  %v805_v21 = vadd.f32 %v868_v62, %v750_v19 }
 0x1e0   :  { %823 = vst [vmem:[%s1339_s7 + $0x38] sm:$0xff] %v807_v20 }
 0x1e1   :  { %821 = vst [vmem:[%s1339_s7 + $0x28] sm:$0xff] %v805_v21  ;;  %v1007_v22 = vpop.f32.mrb[8].mxu1 }
 0x1e2   :  { %v810_v23 = vadd.f32 %v1007_v22, %v868_v62  ;;  %v762_v24 = vpop.f32.mrb[9].mxu1 }
 0x1e3   :  { %v808_v25 = vadd.f32 %v868_v62, %v762_v24  ;;  %v1008_v26 = vpop.f32.mrb[10].mxu1 }
 0x1e4   :  { %826 = vst [vmem:[%s1339_s7 + $0x50] sm:$0xff] %v810_v23  ;;  %v811_v27 = vadd.f32 %v1008_v26, %v868_v62  ;;  %v765_v28 = vpop.f32.mrb[11].mxu1 }
 0x1e5   :  { %824 = vst [vmem:[%s1339_s7 + $0x40] sm:$0xff] %v808_v25  ;;  %v809_v29 = vadd.f32 %v868_v62, %v765_v28 }
 0x1e6   :  { %827 = vst [vmem:[%s1339_s7 + $0x58] sm:$0xff] %v811_v27 }
 0x1e7   :  { %825 = vst [vmem:[%s1339_s7 + $0x48] sm:$0xff] %v809_v29 }
 0x1e9   :  { %v1011_v30 = vpop.f32.mrb[12].mxu1 }
 0x1ea   :  { %v814_v31 = vadd.f32 %v1011_v30, %v868_v62  ;;  %v778_v32 = vpop.f32.mrb[13].mxu1 }
 0x1eb   :  { %v812_v33 = vadd.f32 %v868_v62, %v778_v32  ;;  %v1012_v34 = vpop.f32.mrb[14].mxu1 }
 0x1ec   :  { %830 = vst [vmem:[%s1339_s7 + $0x70] sm:$0xff] %v814_v31  ;;  %v815_v35 = vadd.f32 %v1012_v34, %v868_v62  ;;  %v781_v36 = vpop.f32.mrb[15].mxu1 }
 0x1ed   :  { %828 = vst [vmem:[%s1339_s7 + $0x60] sm:$0xff] %v812_v33  ;;  %v813_v37 = vadd.f32 %v868_v62, %v781_v36 }
 0x1ee   :  { %831 = vst [vmem:[%s1339_s7 + $0x78] sm:$0xff] %v815_v35 }
 0x1ef   :  { %829 = vst [vmem:[%s1339_s7 + $0x68] sm:$0xff] %v813_v37 }

// kernel: link_prediction_gnn_forward.2
= control target key start
LH: loop header
LB: loop body
LE: loop exit
PB: predicated region body
PF: predicated region fallthrough
CT: control target
= control target key end

     0   :  { %v1239_v1 = vmov 0   ;;  %s1485_s2 = inlined_call_operand.vmem [shape: bf16[128,128], index: 2, kind: input, shape index: {}, may-alias: {2,3}]   ;;  %s1486_s1 = inlined_call_operand.vmem [shape: s8[128,128], index: 1, kind: input, shape index: {}]   ;;  %s1487_s0 = inlined_call_operand.vmem [shape: f32[128,1], index: 0, kind: input, shape index: {}]   ;;  %s1488_s5 = inlined_call_operand.vmem [shape: bf16[128,128], index: 5, kind: input, shape index: {}]   ;;  %s1489_s4 = inlined_call_operand.vmem [shape: bf16[128,128], index: 4, kind: input, shape index: {}]   ;;  %s1490_s3 = inlined_call_operand.vmem [shape: bf16[128,128], index: 3, kind: input, shape index: {}, may-alias: {2,3}]   ;;  %s1491_s6 = inlined_call_operand.vmem [shape: f32[1,128], index: 6, kind: input, shape index: {}]   ;;  %s1492_s7 = inlined_call_operand.vmem [shape: bf16[128,128], index: 7, kind: output, shape index: {}]  }
   0x1   :  { %v1207_v0 = vld [vmem:[%s1485_s2] sm:$0xff]   ;;  %1206 = vset.pattern.permute.xlu1 %v1239_v1  ;;  %1205 = vset.pattern.permute.xlu0 %v1239_v1  ;;  %v1208_v2 = vld [vmem:[%s1485_s2 + $0x8] sm:$0xff]   ;;  %v1209_v3 = vld [vmem:[%s1485_s2 + $0x10] sm:$0xff]  }
   0x2   :  { %1076 = vmatprep.subr.bf16.mxu0 %v1207_v0  ;;  %v1210_v4 = vld [vmem:[%s1485_s2 + $0x18] sm:$0xff]   ;;  %v1295_v5 = vld [vmem:[%s1486_s1] sm:$0xff]  ;;  %v289_v7 = vld [vmem:[%s1487_s0 + $0x10] sm:$0xff] }
   0x3   :  { %1077 = vmatpush3.bf16.msra.mxu0 %v1207_v0  ;;  %v51_v6 = vunpack.c.l.s8.bf16 %v1295_v5  ;;  %v287_v8 = vld [vmem:[%s1487_s0] sm:$0xff]  ;;  %315 = vperm.xlu1 %1206, %v289_v7   ;;  %v290_v9 = vld [vmem:[%s1487_s0 + $0x18] sm:$0xff]  ;;  %v288_v10 = vld [vmem:[%s1487_s0 + $0x8] sm:$0xff]  ;;  %v52_v32 = vunpack.c.h.s8.bf16 %v1295_v5 }
   0x4   :  { %1078 = vmatprep.subr.bf16.mxu0 %v1208_v2  ;;  %305 = vperm.xlu0 %1205, %v287_v8   ;;  %v1211_v11 = vld [vmem:[%s1485_s2 + $0x20] sm:$0xff]   ;;  %v1212_v12 = vld [vmem:[%s1485_s2 + $0x28] sm:$0xff]   ;;  %v1213_v17 = vld [vmem:[%s1485_s2 + $0x30] sm:$0xff]  }
   0x5   :  { %1092 = vmatprep.mubr.bf16.mxu0 %v51_v6  ;;  %v296_v13 = vld [vmem:[%s1487_s0 + $0x48] sm:$0xff]  ;;  %v295_v14 = vld [vmem:[%s1487_s0 + $0x40] sm:$0xff]  ;;  %v298_v18 = vld [vmem:[%s1487_s0 + $0x58] sm:$0xff] }
   0x6   :  { %v1215_v15 = vld [vmem:[%s1488_s5] sm:$0xff]   ;;  %v1216_v16 = vld [vmem:[%s1488_s5 + $0x8] sm:$0xff]   ;;  %v297_v19 = vld [vmem:[%s1487_s0 + $0x50] sm:$0xff] }
   0x7   :  { %1079 = vmatpush3.bf16.msra.mxu0 %v1208_v2  ;;  %320 = vperm.xlu1 %1206, %v290_v9   ;;  %v1217_v20 = vld [vmem:[%s1488_s5 + $0x10] sm:$0xff]   ;;  %v1214_v21 = vld [vmem:[%s1485_s2 + $0x38] sm:$0xff]   ;;  %v292_v22 = vld [vmem:[%s1487_s0 + $0x28] sm:$0xff] }
   0x8   :  { %1080 = vmatprep.subr.bf16.mxu0 %v1209_v3  ;;  %310 = vperm.xlu0 %1205, %v288_v10   ;;  %v291_v23 = vld [vmem:[%s1487_s0 + $0x20] sm:$0xff]  ;;  %v1218_v24 = vld [vmem:[%s1488_s5 + $0x18] sm:$0xff]   ;;  %v293_v26 = vld [vmem:[%s1487_s0 + $0x30] sm:$0xff] }
   0x9   :  { %1108 = vmatprep.subr.bf16.mxu1 %v1215_v15  ;;  %v294_v25 = vld [vmem:[%s1487_s0 + $0x38] sm:$0xff]  ;;  %v48_v27 = vld [vmem:[%s1486_s1 + $0x8] sm:$0xff]  ;;  %v1226_v28 = vld [vmem:[%s1490_s3] sm:$0xff]  }
   0xa   :  { %1109 = vmatpush3.bf16.msra.mxu1 %v1215_v15  ;;  %v1219_v29 = vld [vmem:[%s1488_s5 + $0x20] sm:$0xff]   ;;  %v300_v31 = vld [vmem:[%s1487_s0 + $0x68] sm:$0xff]  ;;  %1124 = vmatprep.mubr.bf16.mxu1 %v1226_v28  ;;  %v53_v34 = vunpack.c.l.s8.bf16 %v48_v27  ;;  %v49_v37 = vld [vmem:[%s1486_s1 + $0x10] sm:$0xff]  ;;  %v54_v42 = vunpack.c.h.s8.bf16 %v48_v27 }
   0xb   :  { %1081 = vmatpush3.bf16.msra.mxu0 %v1209_v3  ;;  %350 = vperm.xlu1 %1206, %v296_v13   ;;  %v1220_v30 = vld [vmem:[%s1489_s4] sm:$0xff]   ;;  %v1221_v35 = vld [vmem:[%s1488_s5 + $0x28] sm:$0xff]   ;;  %v302_v38 = vld [vmem:[%s1487_s0 + $0x78] sm:$0xff]  ;;  %v55_v43 = vunpack.c.l.s8.bf16 %v49_v37  ;;  %v56_v48 = vunpack.c.h.s8.bf16 %v49_v37 }
   0xc   :  { %1082 = vmatprep.subr.bf16.mxu0 %v1210_v4  ;;  %345 = vperm.xlu0 %1205, %v295_v14   ;;  %v299_v33 = vld [vmem:[%s1487_s0 + $0x60] sm:$0xff]  ;;  %v1222_v36 = vld [vmem:[%s1489_s4 + $0x8] sm:$0xff]   ;;  %v301_v39 = vld [vmem:[%s1487_s0 + $0x70] sm:$0xff] }
   0xd   :  { %1110 = vmatprep.subr.bf16.mxu1 %v1216_v16  ;;  %v1223_v40 = vld [vmem:[%s1488_s5 + $0x30] sm:$0xff]   ;;  %v1225_v44 = vld [vmem:[%s1488_s5 + $0x38] sm:$0xff]   ;;  %v1229_v47 = vld [vmem:[%s1489_s4 + $0x20] sm:$0xff]  }
   0xe   :  { %1111 = vmatpush3.bf16.msra.mxu1 %v1216_v16  ;;  %v1224_v41 = vld [vmem:[%s1489_s4 + $0x10] sm:$0xff]   ;;  %v1227_v45 = vld [vmem:[%s1489_s4 + $0x18] sm:$0xff]   ;;  %v1228_v50 = vld [vmem:[%s1490_s3 + $0x8] sm:$0xff]  }
   0xf   :  { %1083 = vmatpush3.bf16.msra.mxu0 %v1210_v4  ;;  %360 = vperm.xlu1 %1206, %v298_v18   ;;  %v50_v46 = vld [vmem:[%s1486_s1 + $0x18] sm:$0xff]  ;;  %v1230_v51 = vld [vmem:[%s1490_s3 + $0x10] sm:$0xff]   ;;  %v1231_v52 = vld [vmem:[%s1489_s4 + $0x28] sm:$0xff]  }
  0x10   :  { %1084 = vmatprep.subr.bf16.mxu0 %v1211_v11  ;;  %355 = vperm.xlu0 %1205, %v297_v19   ;;  %v57_v49 = vunpack.c.l.s8.bf16 %v50_v46  ;;  %v58_v53 = vunpack.c.h.s8.bf16 %v50_v46  ;;  %v1232_v54 = vld [vmem:[%s1490_s3 + $0x18] sm:$0xff]   ;;  %v1233_v55 = vld [vmem:[%s1489_s4 + $0x30] sm:$0xff]   ;;  %v1235_v57 = vld [vmem:[%s1490_s3 + $0x20] sm:$0xff]  }
  0x11   :  { %1112 = vmatprep.subr.bf16.mxu1 %v1217_v20  ;;  %v1234_v56 = vld [vmem:[%s1489_s4 + $0x38] sm:$0xff]   ;;  %v1236_v58 = vld [vmem:[%s1490_s3 + $0x28] sm:$0xff]   ;;  %v1237_v59 = vld [vmem:[%s1490_s3 + $0x30] sm:$0xff]  }
  0x12   :  { %1113 = vmatpush3.bf16.msra.mxu1 %v1217_v20  ;;  %v1238_v60 = vld [vmem:[%s1490_s3 + $0x38] sm:$0xff]  }
  0x13   :  { %1085 = vmatpush3.bf16.msra.mxu0 %v1211_v11  ;;  %330 = vperm.xlu1 %1206, %v292_v22  }
  0x14   :  { %1086 = vmatprep.subr.bf16.mxu0 %v1212_v12  ;;  %325 = vperm.xlu0 %1205, %v291_v23  }
  0x15   :  { %1114 = vmatprep.subr.bf16.mxu1 %v1218_v24 }
  0x16   :  { %1115 = vmatpush3.bf16.msra.mxu1 %v1218_v24 }
  0x17   :  { %1087 = vmatpush3.bf16.msra.mxu0 %v1212_v12  ;;  %340 = vperm.xlu1 %1206, %v294_v25  }
  0x18   :  { %1088 = vmatprep.subr.bf16.mxu0 %v1213_v17  ;;  %335 = vperm.xlu0 %1205, %v293_v26  }
  0x19   :  { %1116 = vmatprep.subr.bf16.mxu1 %v1219_v29 }
  0x1a   :  { %1117 = vmatpush3.bf16.msra.mxu1 %v1219_v29 }
  0x1b   :  { %1089 = vmatpush3.bf16.msra.mxu0 %v1213_v17  ;;  %370 = vperm.xlu1 %1206, %v300_v31  }
  0x1c   :  { %1090 = vmatprep.subr.bf16.mxu0 %v1214_v21  ;;  %365 = vperm.xlu0 %1205, %v299_v33  }
  0x1d   :  { %1118 = vmatprep.subr.bf16.mxu1 %v1221_v35 }
  0x1e   :  { %1119 = vmatpush3.bf16.msra.mxu1 %v1221_v35 }
  0x1f   :  { %1091 = vmatpush3.bf16.msra.mxu0 %v1214_v21  ;;  %380 = vperm.xlu1 %1206, %v302_v38  }
  0x20   :  { %1140 = vmatprep.subr.bf16.mxu0 %v1220_v30  ;;  %375 = vperm.xlu0 %1205, %v301_v39  }
  0x21   :  { %1120 = vmatprep.subr.bf16.mxu1 %v1223_v40 }
  0x22   :  { %1093 = vmatmul.mubr.bf16.vlgmr.msra.gmra.mrb[0].mxu0 %v52_v32  ;;  %1121 = vmatpush3.bf16.msra.mxu1 %v1223_v40 }
  0x23   :  { %1096 = vmatprep.mubr.bf16.mxu0 %v53_v34  ;;  %1141 = vmatpush3.bf16.msra.mxu0 %v1220_v30 }
  0x24   :  { %1142 = vmatprep.subr.bf16.mxu0 %v1222_v36  ;;  %1122 = vmatprep.subr.bf16.mxu1 %v1225_v44 }
  0x26   :  { %1123 = vmatpush3.bf16.msra.mxu1 %v1225_v44 }
  0x27   :  { %1143 = vmatpush3.bf16.msra.mxu0 %v1222_v36  ;;  %1172 = vmatprep.subr.bf16.mxu1 %v1220_v30 }
  0x28   :  { %1144 = vmatprep.subr.bf16.mxu0 %v1224_v41 }
  0x29   :  { %1125 = vmatmul.mubr.bf16.vlgmr.msra.gmra.mrb[0].mxu1 %v1228_v50 }
  0x2a   :  { %1097 = vmatmul.mubr.bf16.gmra.mrb[4].mxu0 %v54_v42  ;;  %1180 = vmatpush3.bf16.msra.mxu1 %v1220_v30 }
  0x2b   :  { %1100 = vmatprep.mubr.bf16.mxu0 %v55_v43  ;;  %1145 = vmatpush3.bf16.msra.mxu0 %v1224_v41 }
  0x2c   :  { %1146 = vmatprep.subr.bf16.mxu0 %v1227_v45  ;;  %1173 = vmatprep.subr.bf16.mxu1 %v1222_v36 }
  0x2d   :  { %1128 = vmatprep.mubr.bf16.mxu1 %v1230_v51 }
  0x2e   :  { %1181 = vmatpush3.bf16.msra.mxu1 %v1222_v36 }
  0x2f   :  { %1147 = vmatpush3.bf16.msra.mxu0 %v1227_v45  ;;  %1174 = vmatprep.subr.bf16.mxu1 %v1224_v41 }
  0x30   :  { %1148 = vmatprep.subr.bf16.mxu0 %v1229_v47 }
  0x31   :  { %1129 = vmatmul.mubr.bf16.gmra.mrb[4].mxu1 %v1232_v54 }
  0x32   :  { %1101 = vmatmul.mubr.bf16.gmra.mrb[8].mxu0 %v56_v48  ;;  %1182 = vmatpush3.bf16.msra.mxu1 %v1224_v41 }
  0x33   :  { %1104 = vmatprep.mubr.bf16.mxu0 %v57_v49  ;;  %1149 = vmatpush3.bf16.msra.mxu0 %v1229_v47 }
  0x34   :  { %1150 = vmatprep.subr.bf16.mxu0 %v1231_v52  ;;  %1175 = vmatprep.subr.bf16.mxu1 %v1227_v45 }
  0x35   :  { %1132 = vmatprep.mubr.bf16.mxu1 %v1235_v57 }
  0x36   :  { %1183 = vmatpush3.bf16.msra.mxu1 %v1227_v45 }
  0x37   :  { %1151 = vmatpush3.bf16.msra.mxu0 %v1231_v52  ;;  %1176 = vmatprep.subr.bf16.mxu1 %v1229_v47 }
  0x38   :  { %1152 = vmatprep.subr.bf16.mxu0 %v1233_v55 }
  0x39   :  { %1133 = vmatmul.mubr.bf16.gmra.mrb[8].mxu1 %v1236_v58 }
  0x3a   :  { %1105 = vmatmul.mubr.bf16.gmra.mrb[12].mxu0 %v58_v53  ;;  %1184 = vmatpush3.bf16.msra.mxu1 %v1229_v47 }
  0x3b   :  { %1177 = vmatprep.subr.bf16.mxu1 %v1231_v52  ;;  %1153 = vmatpush3.bf16.msra.mxu0 %v1233_v55 }
  0x3c   :  { %1154 = vmatprep.subr.bf16.mxu0 %v1234_v56  ;;  %1136 = vmatprep.mubr.bf16.mxu1 %v1237_v59 }
  0x3e   :  { %1185 = vmatpush3.bf16.msra.mxu1 %v1231_v52 }
  0x3f   :  { %1178 = vmatprep.subr.bf16.mxu1 %v1233_v55  ;;  %1155 = vmatpush3.bf16.msra.mxu0 %v1234_v56 }
  0x41   :  { %1137 = vmatmul.mubr.bf16.gmra.mrb[12].mxu1 %v1238_v60 }
  0x42   :  { %1186 = vmatpush3.bf16.msra.mxu1 %v1233_v55 }
  0x43   :  { %1179 = vmatprep.subr.bf16.mxu1 %v1234_v56 }
  0x46   :  { %1187 = vmatpush3.bf16.msra.mxu1 %v1234_v56 }
  0x82   :  { %v316_v61 = vpop.permute.xlu1 %315 }
  0x83   :  { %v306_v62 = vpop.permute.xlu0 %305 }
  0x86   :  { %v321_v63 = vpop.permute.xlu1 %320 }
  0x87   :  { %v311_v0 = vpop.permute.xlu0 %310 }
  0x8a   :  { %v351_v1 = vpop.permute.xlu1 %350 }
  0x8b   :  { %v346_v2 = vpop.permute.xlu0 %345 }
  0x8e   :  { %v361_v3 = vpop.permute.xlu1 %360 }
  0x8f   :  { %v356_v4 = vpop.permute.xlu0 %355 }
  0x92   :  { %v331_v8 = vpop.permute.xlu1 %330 }
  0x93   :  { %v326_v12 = vpop.permute.xlu0 %325 }
  0x96   :  { %v341_v18 = vpop.permute.xlu1 %340 }
  0x97   :  { %v336_v20 = vpop.permute.xlu0 %335 }
  0x9a   :  { %v371_v29 = vpop.permute.xlu1 %370 }
  0x9b   :  { %v366_v30 = vpop.permute.xlu0 %365 }
  0x9e   :  { %v381_v45 = vpop.permute.xlu1 %380 }
  0x9f   :  { %v376_v46 = vpop.permute.xlu0 %375 }
  0xf5   :  { %v1094_v5 = vpop.f32.mrb[0].mxu0 }
  0xf6   :  { %v173_v6 = vpop.f32.mrb[1].mxu0  ;;  %v385_v9 = vmul.f32 %v1094_v5, %v316_v61 }
  0xf7   :  { %v1095_v7 = vpop.f32.mrb[2].mxu0  ;;  %v383_v13 = vmul.f32 %v306_v62, %v173_v6  ;;  %v1443_v62 = vld [vmem:[%s1491_s6] ss:$0 sm:$0xff] }
  0xf8   :  { %v386_v10 = vmul.f32 %v1095_v7, %v321_v63  ;;  %v176_v11 = vpop.f32.mrb[3].mxu0 }
  0xf9   :  { %v384_v14 = vmul.f32 %v311_v0, %v176_v11 }
  0xfa   :  { %v400_v15 = vpack.c.bf16 %v386_v10, %v385_v9 }
  0xfb   :  { %v399_v16 = vpack.c.bf16 %v384_v14, %v383_v13 }
  0xfc   :  { %v1126_v33 = vpop.f32.mrb[0].mxu1 }
  0xfd   :  { %v1098_v17 = vpop.f32.mrb[4].mxu0  ;;  %1156 = vmatprep.mubr.bf16.mxu0 %v399_v16  ;;  %v585_v35 = vpop.f32.mrb[1].mxu1 }
  0xfe   :  { %v189_v19 = vpop.f32.mrb[5].mxu0  ;;  %1157 = vmatmul.mubr.bf16.vlgmr.msra.gmra.mrb[16].mxu0 %v400_v15  ;;  %v389_v22 = vmul.f32 %v1098_v17, %v336_v20  ;;  %v1127_v39 = vpop.f32.mrb[2].mxu1 }
  0xff   :  { %v1099_v21 = vpop.f32.mrb[6].mxu0  ;;  %v387_v25 = vmul.f32 %v326_v12, %v189_v19  ;;  %v588_v42 = vpop.f32.mrb[3].mxu1 }
 0x100   :  { %v390_v23 = vmul.f32 %v1099_v21, %v341_v18  ;;  %v192_v24 = vpop.f32.mrb[7].mxu0 }
 0x101   :  { %v388_v26 = vmul.f32 %v331_v8, %v192_v24 }
 0x102   :  { %v402_v27 = vpack.c.bf16 %v390_v23, %v389_v22 }
 0x103   :  { %v401_v28 = vpack.c.bf16 %v388_v26, %v387_v25 }
 0x104   :  { %v1130_v49 = vpop.f32.mrb[4].mxu1 }
 0x105   :  { %v1102_v31 = vpop.f32.mrb[8].mxu0  ;;  %1160 = vmatprep.mubr.bf16.mxu0 %v401_v28  ;;  %v601_v51 = vpop.f32.mrb[5].mxu1 }
 0x106   :  { %v205_v32 = vpop.f32.mrb[9].mxu0  ;;  %1161 = vmatmul.mubr.bf16.gmra.mrb[20].mxu0 %v402_v27  ;;  %v393_v36 = vmul.f32 %v1102_v31, %v356_v4  ;;  %v1131_v55 = vpop.f32.mrb[6].mxu1 }
 0x107   :  { %v1103_v34 = vpop.f32.mrb[10].mxu0  ;;  %v391_v40 = vmul.f32 %v346_v2, %v205_v32  ;;  %v604_v58 = vpop.f32.mrb[7].mxu1 }
 0x108   :  { %v394_v37 = vmul.f32 %v1103_v34, %v361_v3  ;;  %v208_v38 = vpop.f32.mrb[11].mxu0 }
 0x109   :  { %v392_v41 = vmul.f32 %v351_v1, %v208_v38 }
 0x10a   :  { %v404_v43 = vpack.c.bf16 %v394_v37, %v393_v36 }
 0x10b   :  { %v403_v44 = vpack.c.bf16 %v392_v41, %v391_v40 }
 0x10d   :  { %v1106_v47 = vpop.f32.mrb[12].mxu0  ;;  %1164 = vmatprep.mubr.bf16.mxu1 %v403_v44 }
 0x10e   :  { %v221_v48 = vpop.f32.mrb[13].mxu0  ;;  %1165 = vmatmul.mubr.bf16.vlgmr.msra.gmra.mrb[8].mxu1 %v404_v43  ;;  %v397_v52 = vmul.f32 %v1106_v47, %v376_v46 }
 0x10f   :  { %v1107_v50 = vpop.f32.mrb[14].mxu0  ;;  %v395_v56 = vmul.f32 %v366_v30, %v221_v48 }
 0x110   :  { %v398_v53 = vmul.f32 %v1107_v50, %v381_v45  ;;  %v224_v54 = vpop.f32.mrb[15].mxu0 }
 0x111   :  { %v396_v57 = vmul.f32 %v371_v29, %v224_v54 }
 0x112   :  { %v406_v59 = vpack.c.bf16 %v398_v53, %v397_v52 }
 0x113   :  { %v405_v60 = vpack.c.bf16 %v396_v57, %v395_v56 }
 0x115   :  { %1168 = vmatprep.mubr.bf16.mxu1 %v405_v60 }
 0x116   :  { %1169 = vmatmul.mubr.bf16.gmra.mrb[12].mxu1 %v406_v59 }
 0x1d1   :  { %v1158_v61 = vpop.f32.mrb[16].mxu0 }
 0x1d2   :  { %v739_v63 = vadd.f32 %v1158_v61, %v1126_v33  ;;  %v730_v0 = vpop.f32.mrb[17].mxu0 }
 0x1d3   :  { %v731_v1 = vadd.f32 %v730_v0, %v585_v35  ;;  %v1159_v2 = vpop.f32.mrb[18].mxu0 }
 0x1d4   :  { %v802_v3 = vadd.f32 %v1443_v62, %v739_v63  ;;  %v742_v4 = vadd.f32 %v1159_v2, %v1127_v39  ;;  %v733_v5 = vpop.f32.mrb[19].mxu0 }
 0x1d5   :  { %v800_v6 = vadd.f32 %v1443_v62, %v731_v1  ;;  %v734_v7 = vadd.f32 %v733_v5, %v588_v42 }
 0x1d6   :  { %v803_v8 = vadd.f32 %v1443_v62, %v742_v4  ;;  %v818_v10 = vmax.f32 %v802_v3, 0.0 }
 0x1d7   :  { %v801_v9 = vadd.f32 %v1443_v62, %v734_v7  ;;  %v816_v12 = vmax.f32 %v800_v6, 0.0 }
 0x1d8   :  { %v819_v11 = vmax.f32 %v803_v8, 0.0 }
 0x1d9   :  { %v817_v13 = vmax.f32 %v801_v9, 0.0  ;;  %v1162_v14 = vpop.f32.mrb[20].mxu0 }
 0x1da   :  { %v989_v15 = vpack.c.bf16 %v819_v11, %v818_v10  ;;  %v755_v16 = vadd.f32 %v1162_v14, %v1130_v49  ;;  %v746_v17 = vpop.f32.mrb[21].mxu0 }
 0x1db   :  { %v984_v18 = vpack.c.bf16 %v817_v13, %v816_v12  ;;  %v747_v19 = vadd.f32 %v746_v17, %v601_v51  ;;  %v1163_v20 = vpop.f32.mrb[22].mxu0 }
 0x1dc   :  { %1021 = vst [vmem:[%s1492_s7 + $0x8] sm:$0xff] %v989_v15   ;;  %v806_v21 = vadd.f32 %v1443_v62, %v755_v16  ;;  %v758_v22 = vadd.f32 %v1163_v20, %v1131_v55  ;;  %v749_v23 = vpop.f32.mrb[23].mxu0 }
 0x1dd   :  { %985 = vst [vmem:[%s1492_s7] sm:$0xff] %v984_v18   ;;  %v804_v24 = vadd.f32 %v1443_v62, %v747_v19  ;;  %v750_v25 = vadd.f32 %v749_v23, %v604_v58 }
 0x1de   :  { %v807_v26 = vadd.f32 %v1443_v62, %v758_v22  ;;  %v822_v28 = vmax.f32 %v806_v21, 0.0 }
 0x1df   :  { %v805_v27 = vadd.f32 %v1443_v62, %v750_v25  ;;  %v820_v30 = vmax.f32 %v804_v24, 0.0 }
 0x1e0   :  { %v823_v29 = vmax.f32 %v807_v26, 0.0 }
 0x1e1   :  { %v821_v31 = vmax.f32 %v805_v27, 0.0  ;;  %v1166_v32 = vpop.f32.mrb[8].mxu1 }
 0x1e2   :  { %v999_v33 = vpack.c.bf16 %v823_v29, %v822_v28  ;;  %v810_v34 = vadd.f32 %v1166_v32, %v1443_v62  ;;  %v762_v35 = vpop.f32.mrb[9].mxu1 }
 0x1e3   :  { %v994_v36 = vpack.c.bf16 %v821_v31, %v820_v30  ;;  %v808_v37 = vadd.f32 %v1443_v62, %v762_v35  ;;  %v1167_v38 = vpop.f32.mrb[10].mxu1 }
 0x1e4   :  { %1023 = vst [vmem:[%s1492_s7 + $0x18] sm:$0xff] %v999_v33   ;;  %v811_v39 = vadd.f32 %v1167_v38, %v1443_v62  ;;  %v765_v40 = vpop.f32.mrb[11].mxu1  ;;  %v826_v42 = vmax.f32 %v810_v34, 0.0 }
 0x1e5   :  { %1022 = vst [vmem:[%s1492_s7 + $0x10] sm:$0xff] %v994_v36   ;;  %v809_v41 = vadd.f32 %v1443_v62, %v765_v40  ;;  %v824_v44 = vmax.f32 %v808_v37, 0.0 }
 0x1e6   :  { %v827_v43 = vmax.f32 %v811_v39, 0.0 }
 0x1e7   :  { %v825_v45 = vmax.f32 %v809_v41, 0.0 }
 0x1e8   :  { %v1009_v46 = vpack.c.bf16 %v827_v43, %v826_v42 }
 0x1e9   :  { %v1004_v47 = vpack.c.bf16 %v825_v45, %v824_v44  ;;  %v1170_v48 = vpop.f32.mrb[12].mxu1 }
 0x1ea   :  { %1025 = vst [vmem:[%s1492_s7 + $0x28] sm:$0xff] %v1009_v46   ;;  %v814_v49 = vadd.f32 %v1170_v48, %v1443_v62  ;;  %v778_v50 = vpop.f32.mrb[13].mxu1 }
 0x1eb   :  { %1024 = vst [vmem:[%s1492_s7 + $0x20] sm:$0xff] %v1004_v47   ;;  %v812_v51 = vadd.f32 %v1443_v62, %v778_v50  ;;  %v1171_v52 = vpop.f32.mrb[14].mxu1 }
 0x1ec   :  { %v815_v53 = vadd.f32 %v1171_v52, %v1443_v62  ;;  %v781_v54 = vpop.f32.mrb[15].mxu1  ;;  %v830_v56 = vmax.f32 %v814_v49, 0.0 }
 0x1ed   :  { %v813_v55 = vadd.f32 %v1443_v62, %v781_v54  ;;  %v828_v58 = vmax.f32 %v812_v51, 0.0 }
 0x1ee   :  { %v831_v57 = vmax.f32 %v815_v53, 0.0 }
 0x1ef   :  { %v829_v59 = vmax.f32 %v813_v55, 0.0 }
 0x1f0   :  { %v1019_v60 = vpack.c.bf16 %v831_v57, %v830_v56 }
 0x1f1   :  { %v1014_v61 = vpack.c.bf16 %v829_v59, %v828_v58 }
 0x1f2   :  { %1027 = vst [vmem:[%s1492_s7 + $0x38] sm:$0xff] %v1019_v60  }
 0x1f3   :  { %1026 = vst [vmem:[%s1492_s7 + $0x30] sm:$0xff] %v1014_v61  }

</bundles_post_ra>
